<compile_context>
chip_gen: v7x
topology: tpu7x:2x2x1
jax: 0.10.0
libtpu: 0.0.40
codegen_flags: <defaults>
</compile_context>

<pallas_src>
import math

import jax
import jax.numpy as jnp
from jax import lax
from jax.experimental import pallas as pl
from jax.experimental.pallas import tpu as pltpu

LANE = 128
SUBLANE = 8
MAX_BLOCK_ROWS = 2048      # 2048 * 128 * 4B = 1 MiB per f32 input block
NUM_SLICES = 2             # leading 'parallel' axis (megacore split on v7x)


def _round_up(a, b):
    return (a + b - 1) // b * b


def _charbonnier_kernel(eps, n_valid, block_rows, tiles_per_slice):
    tile_elems = block_rows * LANE

    def kernel(x_ref, y_ref, o_ref, acc_ref):
        c = pl.program_id(0)          # parallel slice (per-core partial sum)
        j = pl.program_id(1)          # reduction over row tiles

        @pl.when(j == 0)
        def _():
            acc_ref[...] = jnp.zeros_like(acc_ref)

        # Flat in-tile index (loop-invariant; hoistable) and the number of
        # valid elements remaining for this tile. Masks both the <128-element
        # ragged tail and any clamped / duplicate out-of-range tiles, so no
        # post-hoc padding correction is needed.
        row = lax.broadcasted_iota(jnp.int32, (block_rows, LANE), 0)
        lane = lax.broadcasted_iota(jnp.int32, (block_rows, LANE), 1)
        local = row * LANE + lane
        tile_idx = c * tiles_per_slice + j
        rem = jnp.int32(n_valid) - tile_idx * jnp.int32(tile_elems)
        valid = local < rem

        diff = x_ref[...].astype(jnp.float32) - y_ref[...].astype(jnp.float32)
        val = jnp.sqrt(diff * diff + jnp.float32(eps))
        val = jnp.where(valid, val, jnp.float32(0.0))

        # Sublane reduce only: keep 128 lane-parallel partial sums per step.
        acc_ref[...] += jnp.sum(val, axis=0, keepdims=True)

        # Single write of this slice's partial sums at the end of the sweep.
        @pl.when(j == pl.num_programs(1) - 1)
        def _():
            o_ref[...] = acc_ref[...][None]

    return kernel


def charbonnier_loss(x, y, eps=1e-6):
    """sum(sqrt((x - y)^2 + eps)) over all elements (any matching shapes)."""
    assert x.shape == y.shape
    n = math.prod(x.shape)
    assert n > 0

    xf = jnp.reshape(x, (-1,))
    yf = jnp.reshape(y, (-1,))

    # Pad only if the element count is not a multiple of the lane width.
    # Padded elements are masked inside the kernel, so the pad value is moot.
    n_pad = (-n) % LANE
    if n_pad:
        xf = jnp.pad(xf, (0, n_pad))
        yf = jnp.pad(yf, (0, n_pad))
    rows = (n + n_pad) // LANE
    x2d = jnp.reshape(xf, (rows, LANE))   # keep original dtype; cast in-kernel
    y2d = jnp.reshape(yf, (rows, LANE))

    block_rows = min(MAX_BLOCK_ROWS, _round_up(rows, SUBLANE))
    total_tiles = pl.cdiv(rows, block_rows)
    tiles_per_slice = pl.cdiv(total_tiles, NUM_SLICES)

    def in_map(c, j):
        # Clamp so overhanging tiles stay in range; the kernel's element mask
        # zeroes their contribution.
        t = jnp.minimum(c * tiles_per_slice + j, total_tiles - 1)
        return (t, 0)

    out = pl.pallas_call(
        _charbonnier_kernel(eps, n, block_rows, tiles_per_slice),
        out_shape=jax.ShapeDtypeStruct((NUM_SLICES, 1, LANE), jnp.float32),
        grid_spec=pltpu.PrefetchScalarGridSpec(
            num_scalar_prefetch=0,
            grid=(NUM_SLICES, tiles_per_slice),
            in_specs=[
                pl.BlockSpec((block_rows, LANE), in_map),
                pl.BlockSpec((block_rows, LANE), in_map),
            ],
            # Per-slice lane-dense partial sums, resident across the
            # reduction axis; summed once in the wrapper.
            out_specs=pl.BlockSpec((1, 1, LANE), lambda c, j: (c, 0, 0)),
            scratch_shapes=[pltpu.VMEM((1, LANE), jnp.float32)],
        ),
        compiler_params=pltpu.CompilerParams(
            dimension_semantics=("parallel", "arbitrary"),
        ),
    )(x2d, y2d)

    return jnp.sum(out)


if __name__ == "__main__":
    key = jax.random.PRNGKey(0)
    kx, ky = jax.random.split(key)
    # Small NCHW inputs, consistent with the PyTorch module's forward.
    x = jax.random.normal(kx, (2, 4, 16, 16), dtype=jnp.float32)
    y = jax.random.normal(ky, (2, 4, 16, 16), dtype=jnp.float32)

    loss = charbonnier_loss(x, y, eps=1e-6)
    loss = jax.block_until_ready(loss)

    # Pure-JAX reference (same math as the PyTorch module).
    diff = x - y
    ref = jnp.sum(jnp.sqrt(diff * diff + 1e-6))
    assert jnp.allclose(loss, ref, rtol=1e-5, atol=1e-4), (loss, ref)

    print("KERNEL_OK")
</pallas_src>

<mosaic_0001>
module attributes {stable_mosaic.version = 11 : i64} {
  func.func @kernel(%arg0: i32, %arg1: i32, %arg2: memref<16x128xf32, #tpu.memory_space<vmem>>, %arg3: memref<16x128xf32, #tpu.memory_space<vmem>>, %arg4: memref<1x1x128xf32, #tpu.memory_space<vmem>>, %arg5: memref<1x128xf32, #tpu.memory_space<vmem>>) attributes {dimension_semantics = [#tpu.dimension_semantics<parallel>, #tpu.dimension_semantics<arbitrary>], iteration_bounds = array<i64: 2, 1>, scalar_prefetch = 0 : i64, scratch_operands = 1 : i64, tpu.core_type = #tpu.core_type<tc>, window_params = [{transform_indices = @transform_0, window_bounds = array<i64: 16, 128>}, {transform_indices = @transform_1, window_bounds = array<i64: 16, 128>}, {transform_indices = @transform_2, window_bounds = array<i64: 1, 1, 128>}]} {
    %c0_i32 = arith.constant 0 : i32
    %0 = arith.cmpi eq, %arg1, %c0_i32 : i32
    %1 = arith.extui %0 : i1 to i32
    %c0_i32_0 = arith.constant 0 : i32
    %2 = arith.cmpi ne, %1, %c0_i32_0 : i32
    scf.if %2 {
      %cst_13 = arith.constant 0.000000e+00 : f32
      %31 = vector.broadcast %cst_13 : f32 to vector<1x128xf32>
      %c0_14 = arith.constant 0 : index
      %c0_15 = arith.constant 0 : index
      %32 = vector.load %arg5[%c0_14, %c0_15] : memref<1x128xf32, #tpu.memory_space<vmem>>, vector<1x128xf32>
      tpu.vector_store %arg5[%c0_14, %c0_15], %31 {strides = array<i32>} : memref<1x128xf32, #tpu.memory_space<vmem>>, vector<1x128xf32>,
    } else {
    }
    %3 = tpu.iota {dimensions = array<i32: 0>} : vector<16x128xi32>
    %4 = tpu.iota {dimensions = array<i32: 1>} : vector<16x128xi32>
    %c128_i32 = arith.constant 128 : i32
    %5 = vector.broadcast %c128_i32 : i32 to vector<16x128xi32>
    %6 = arith.muli %3, %5 : vector<16x128xi32>
    %7 = arith.addi %6, %4 : vector<16x128xi32>
    %c1_i32 = arith.constant 1 : i32
    %8 = arith.muli %arg0, %c1_i32 : i32
    %9 = arith.addi %8, %arg1 : i32
    %c2048_i32 = arith.constant 2048 : i32
    %10 = arith.muli %9, %c2048_i32 : i32
    %c2048_i32_1 = arith.constant 2048 : i32
    %11 = arith.subi %c2048_i32_1, %10 : i32
    %12 = vector.broadcast %11 : i32 to vector<16x128xi32>
    %13 = arith.cmpi slt, %7, %12 : vector<16x128xi32>
    %c0 = arith.constant 0 : index
    %c0_2 = arith.constant 0 : index
    %14 = vector.load %arg2[%c0, %c0_2] : memref<16x128xf32, #tpu.memory_space<vmem>>, vector<16x128xf32>
    %c0_3 = arith.constant 0 : index
    %c0_4 = arith.constant 0 : index
    %15 = vector.load %arg3[%c0_3, %c0_4] : memref<16x128xf32, #tpu.memory_space<vmem>>, vector<16x128xf32>
    %16 = arith.subf %14, %15 : vector<16x128xf32>
    %17 = arith.mulf %16, %16 : vector<16x128xf32>
    %cst = arith.constant 9.99999997E-7 : f32
    %18 = vector.broadcast %cst : f32 to vector<16x128xf32>
    %19 = arith.addf %17, %18 : vector<16x128xf32>
    %20 = math.sqrt %19 : vector<16x128xf32>
    %cst_5 = arith.constant 0.000000e+00 : f32
    %21 = vector.broadcast %cst_5 : f32 to vector<16x128xf32>
    %22 = arith.select %13, %20, %21 : vector<16x128xi1>, vector<16x128xf32>
    %c0_6 = arith.constant 0 : index
    %c0_7 = arith.constant 0 : index
    %23 = vector.load %arg5[%c0_6, %c0_7] : memref<1x128xf32, #tpu.memory_space<vmem>>, vector<1x128xf32>
    %cst_8 = arith.constant dense<0.000000e+00> : vector<128xf32>
    %24 = vector.multi_reduction <add>, %22, %cst_8 [0] : vector<16x128xf32> to vector<128xf32>
    %25 = vector.shape_cast %24 : vector<128xf32> to vector<1x128xf32>
    %26 = arith.addf %23, %25 : vector<1x128xf32>
    %c0_9 = arith.constant 0 : index
    %c0_10 = arith.constant 0 : index
    %27 = vector.load %arg5[%c0_9, %c0_10] : memref<1x128xf32, #tpu.memory_space<vmem>>, vector<1x128xf32>
    tpu.vector_store %arg5[%c0_9, %c0_10], %26 {strides = array<i32>} : memref<1x128xf32, #tpu.memory_space<vmem>>, vector<1x128xf32>,
    %c0_i32_11 = arith.constant 0 : i32
    %28 = arith.cmpi eq, %arg1, %c0_i32_11 : i32
    %29 = arith.extui %28 : i1 to i32
    %c0_i32_12 = arith.constant 0 : i32
    %30 = arith.cmpi ne, %29, %c0_i32_12 : i32
    scf.if %30 {
      %c0_13 = arith.constant 0 : index
      %c0_14 = arith.constant 0 : index
      %31 = vector.load %arg5[%c0_13, %c0_14] : memref<1x128xf32, #tpu.memory_space<vmem>>, vector<1x128xf32>
      %32 = vector.shape_cast %31 : vector<1x128xf32> to vector<1x1x128xf32>
      %c0_15 = arith.constant 0 : index
      %c0_16 = arith.constant 0 : index
      %c0_17 = arith.constant 0 : index
      %33 = vector.load %arg4[%c0_15, %c0_16, %c0_17] : memref<1x1x128xf32, #tpu.memory_space<vmem>>, vector<1x1x128xf32>
      tpu.vector_store %arg4[%c0_15, %c0_16, %c0_17], %32 {strides = array<i32>} : memref<1x1x128xf32, #tpu.memory_space<vmem>>, vector<1x1x128xf32>,
    } else {
    }
    return
  }
  func.func @transform_0(%arg0: i32, %arg1: i32) -> (i32, i32) {
    %c1_i32 = arith.constant 1 : i32
    %0 = arith.muli %arg0, %c1_i32 : i32
    %1 = arith.addi %0, %arg1 : i32
    %c0_i32 = arith.constant 0 : i32
    %2 = arith.minsi %1, %c0_i32 : i32
    %c0_i32_0 = arith.constant 0 : i32
    %c0_i32_1 = arith.constant 0 : i32
    return %2, %c0_i32_0 : i32, i32
  }
  func.func @transform_1(%arg0: i32, %arg1: i32) -> (i32, i32) {
    %c1_i32 = arith.constant 1 : i32
    %0 = arith.muli %arg0, %c1_i32 : i32
    %1 = arith.addi %0, %arg1 : i32
    %c0_i32 = arith.constant 0 : i32
    %2 = arith.minsi %1, %c0_i32 : i32
    %c0_i32_0 = arith.constant 0 : i32
    %c0_i32_1 = arith.constant 0 : i32
    return %2, %c0_i32_0 : i32, i32
  }
  func.func @transform_2(%arg0: i32, %arg1: i32) -> (i32, i32, i32) {
    %c0_i32 = arith.constant 0 : i32
    %c0_i32_0 = arith.constant 0 : i32
    %c0_i32_1 = arith.constant 0 : i32
    return %arg0, %c0_i32, %c0_i32_0 : i32, i32, i32
  }
}

</mosaic_0001>

<bundles_post_ra>
// kernel: tpu_custom_call.1
= control target key start
LH: loop header
LB: loop body
LE: loop exit
PB: predicated region body
PF: predicated region fallthrough
CT: control target
= control target key end

     0   :  { %7 = vsyncpa [#allocation4], 0  ;;  %s921_s0 = inlined_call_operand.hbm [shape: f32[16,128], index: 0, kind: input, shape index: {}]   ;;  %s922_s1 = inlined_call_operand.hbm [shape: f32[16,128], index: 1, kind: input, shape index: {}]   ;;  %s923_s2 = inlined_call_operand.hbm [shape: f32[2,1,128], index: 2, kind: output, shape index: {}]  }
   0x1   :  { %9 = vsyncpa [#allocation4 + $0x1], 0 }
   0x2   :  { %10 = vsyncpa [#allocation7], 0 }
   0x3   :  { %12 = vsyncpa [#allocation7 + $0x1], 0 }
   0x4   :  { %13 = vsyncpa [#allocation5], 0 }
   0x5   :  { %15 = vsyncpa [#allocation5 + $0x1], 0  ;;  %s717_s9 = smov 0   ;;  %s719_s10 = smov 0  }
   0x6   :  { %s721_s11 = smov 0   ;;  %s723_s12 = smov 0  }
   0x7   :  { %s725_s13 = smov 0   ;;  %s727_s14 = smov 0  }
   0x8   :  { %s729_s15 = smov 0   ;;  %s731_s16 = smov 0  }
   0x9 LB: > { %s410_s17 = sadd.s32 4294967295, %s694_s16   ;;  %s411_s18 = sadd.s32 4294967294, %s694_s16   ;;  %s694_s16 = sphi %s731_s16, %s21_s16   ;;  %s690_s15 = sphi %s729_s15, %s942_s15   ;;  %s686_s14 = sphi %s727_s14, %s941_s14   ;;  %s682_s13 = sphi %s725_s13, %s911_s13   ;;  %s678_s12 = sphi %s723_s12, %s940_s12   ;;  %s674_s11 = sphi %s721_s11, %s939_s11   ;;  %s670_s10 = sphi %s719_s10, %s938_s10   ;;  %s666_s9 = sphi %s717_s9, %s937_s9  }
   0xa   : > { %s33_s19 = sadd.s32 1, %s690_s15  ;;  %p663_p1 = scmp.ne.s32.totalorder %s682_s13, 0 }
   0xb   : > { %p35_p0 = scmp.ge.s32.totalorder %s33_s19, 2  ;;  %p54_p2 = scmp.eq.s32.totalorder %s694_s16, 0 }
   0xc   : > { %p59_p3 = scmp.ne.s32.totalorder %s682_s13, %s678_s12  ;;  %p60_p5 = scmp.eq.s32.totalorder %s410_s17, 0 }
   0xd   : > { %s944_s19 = smov (%p35_p0, %s33_s19), 0  ;;  %p763_p4 = por %p663_p1, %p54_p2 }
   0xe   : > { %p767_p6 = por %p60_p5, %p59_p3  ;;  %s101_s22 = ssub.s32 %s690_s15, %s944_s19 }
   0xf   : > { %p102_p7 = scmp.eq.s32.totalorder %s101_s22, 0  ;;  %s104_s23 = sadd.s32 1, %s674_s11 }
  0x10   : > { %s927_s21 = scalar_select %p767_p6, 1, 0 }
  0x11   : > { %s775_s24 = scalar_select %p102_p7, %s674_s11, %s104_s23  }
  0x12   : > { %p114_p8 = scmp.ne.s32.totalorder %s674_s11, %s670_s10  ;;  %p115_p9 = scmp.eq.s32.totalorder %s410_s17, 1 }
  0x13   : > { %p120_p10 = scmp.ne.s32.totalorder %s670_s10, %s666_s9  ;;  %p121_p11 = scmp.eq.s32.totalorder %s411_s18, 1 }
  0x14   : > { %p781_p12 = por %p115_p9, %p114_p8  ;;  %p446_p1 = scmp.lt.s32.totalorder %s694_s16, 2 }
  0x15   : > { %p786_p0 = por %p121_p11, %p120_p10  ;;  %s696_s27 = smov [#allocation3]  }
  0x16   : > { %s928_s25 = scalar_select %p781_p12, 1, 0 }
  0x17   : > { %s929_s26 = scalar_select %p786_p0, 1, 0 }
  0x18   : > { %s155_s28 = sshll.u32 %s696_s27, 4  ;;  %p793_p2 = pnand %p446_p1, %p763_p4  ;;  %s156_s28 = int_to_ptr.vmem [resolvable:$true] %s155_s28 }
  0x19   : > { %s527_s4 = scalar_lea.hbm %s921_s0, 256 }
  0x1a   : > { %p528_p3 = scmp.ne.s32.totalorder %s921_s0, %s527_s4  ;;  %p529_p5 = pneg %p793_p2 }
  0x1b   : > { %p534_p8 = scmp.lt.u32.totalorder %s527_s4, %s527_s4  ;;  %p536_p9 = scmp.lt.u32.totalorder %s527_s4, %s921_s0 }
  0x1c   : > { %p530_p7 = pnand %p529_p5, %p528_p3 }
  0x1d   : > { %p537_p10 = por %p536_p9, %p534_p8 }
  0x1e   : > { %p531_p4 = pneg %p530_p7 }
  0x20   : > { %p538_p11 = pnand %p537_p10, %p531_p4 }
  0x22   : > { %541 = shalt.err (!%p538_p11)
}
  0x23   : > { %s542_s12 = scalar_lea.vmem %s156_s28, 256  ;;  %s549_s17 = scalar_lea.vmem %s156_s28, 512 }
  0x24   : > { %p543_p1 = scmp.ne.s32.totalorder %s156_s28, %s542_s12  ;;  %p550_p12 = scmp.lt.s32.totalorder %s156_s28, %s156_s28 }
  0x25   : > { %p551_p6 = scmp.lt.s32.totalorder %s549_s17, %s542_s12 }
  0x26   : > { %p545_p13 = pnand %p543_p1, %p529_p5 }
  0x27   : > { %p552_p3 = por %p551_p6, %p550_p12 }
  0x28   : > { %p546_p0 = pneg %p545_p13 }
  0x2a   : > { %p553_p7 = pnand %p552_p3, %p546_p0 }
  0x2c   : > { %556 = shalt.err (!%p553_p7)
}
  0x2d   : > { %s697_s18 = smov 128   ;;  %s698_s20 = smov 8  }
  0x2e   : > { %438 = dma.hbm_to_vmem [thread:$0]  (!%p793_p2), %s921_s0, 256, %s156_s28, [#allocation4], %s697_s18, %s697_s18, %s698_s20  }
  0x2f   : > { %p420_p13 = scmp.ge.s32.totalorder %s694_s16, 1  ;;  %p187_p4 = scmp.lt.s32.totalorder %s694_s16, 3 }
  0x30   : > { %s699_s30 = smov [#allocation6]   ;;  %s557_s6 = scalar_lea.hbm %s922_s1, 256 }
  0x31   : > { %p824_p8 = pnand %p420_p13, %p187_p4  ;;  %s179_s3 = sshll.u32 %s699_s30, 4  ;;  %s180_s3 = int_to_ptr.vmem [resolvable:$true] %s179_s3 }
  0x32   : > { %p558_p6 = scmp.ne.s32.totalorder %s922_s1, %s557_s6  ;;  %p564_p9 = scmp.lt.u32.totalorder %s557_s6, %s557_s6 }
  0x33   : > { %s931_s27 = scalar_select %p824_p8, 1, 0 }
  0x34   : > { %p560_p12 = pnand %p558_p6, %p529_p5  ;;  %p566_p10 = scmp.lt.u32.totalorder %s557_s6, %s922_s1 }
  0x36   : > { %p561_p0 = pneg %p560_p12  ;;  %p567_p11 = por %p566_p10, %p564_p9 }
  0x38   : > { %p568_p1 = pnand %p567_p11, %p561_p0 }
  0x3a   : > { %571 = shalt.err (!%p568_p1)
}
  0x3b   : > { %s572_s17 = scalar_lea.vmem %s180_s3, 256  ;;  %s579_s22 = scalar_lea.vmem %s180_s3, 512 }
  0x3c   : > { %p573_p3 = scmp.ne.s32.totalorder %s180_s3, %s572_s17  ;;  %p580_p4 = scmp.lt.s32.totalorder %s180_s3, %s180_s3 }
  0x3d   : > { %p581_p8 = scmp.lt.s32.totalorder %s579_s22, %s572_s17 }
  0x3e   : > { %p575_p7 = pnand %p573_p3, %p529_p5 }
  0x3f   : > { %p582_p6 = por %p581_p8, %p580_p4 }
  0x40   : > { %p576_p13 = pneg %p575_p7 }
  0x42   : > { %p583_p12 = pnand %p582_p6, %p576_p13 }
  0x44   : > { %586 = shalt.err (!%p583_p12)
}
  0x45   : > { %441 = dma.hbm_to_vmem [thread:$0]  (!%p793_p2), %s922_s1, 256, %s180_s3, [#allocation7], %s697_s18, %s697_s18, %s698_s20  }
  0x46   : > { %p932_p0 = scmp.ne.s32.totalorder %s931_s27, 0 }
  0x47   : > { %s193_s4 = sand.u32 (!%p932_p0), 1, %s682_s13   ;;  %p933_p5 = scmp.ne.s32.totalorder (!%p932_p0), %s927_s21, 0 }
  0x48   : > { %191 = sbr.rel (%p932_p0) target bundleno = 145 (0x91), region = 28  ;;  %s421_s5 = sshll.u32 (!%p932_p0), %s193_s4, 4 }
  0x49   : > { %s194_s6 = scalar_lea.sflag (!%p932_p0), [#allocation4], %s193_s4  ;;  %s197_s7 = scalar_lea.vmem (!%p932_p0), [#allocation3], %s421_s5 }
  0x4f   : > { %652 = dma.done.wait (%p933_p5), %s194_s6, 256  }
  0x50   : > { %654 = vsyncadd (%p933_p5), %s194_s6, 4294967040  ;;  %s203_s29 = scalar_lea.sflag [#allocation7], %s193_s4  ;;  %s206_s8 = scalar_lea.vmem [#allocation6], %s421_s5 }
  0x51   : > { %656 = dma.done.wait (%p933_p5), %s203_s29, 256  }
  0x52   : > { %658 = vsyncadd (%p933_p5), %s203_s29, 4294967040  ;;  %v700_v0 = vmov 0.0   ;;  %v244_v1 = vlaneseq  ;;  %v259_v2 = vld [vmem:[%s197_s7] sm:$0xff]  ;;  %v260_v3 = vld [vmem:[%s197_s7 + $0x8] sm:$0xff]  ;;  %s423_s21 = sshll.u32 %s686_s14, 11  ;;  %s229_s20 = sand.u32 1, %s670_s10  }
  0x53   : > { %243 = vst [vmem:[#allocation2] sm:$0x1] %v700_v0  ;;  %v261_v4 = vld [vmem:[%s206_s8] sm:$0xff]  ;;  %v262_v5 = vld [vmem:[%s206_s8 + $0x8] sm:$0xff]  ;;  %s255_s18 = ssub.s32 2048, %s423_s21  ;;  %s230_s27 = scalar_lea.vmem [#allocation8], %s229_s20 }
  0x54   : > { %v263_v6 = vsub.f32 %v259_v2, %v261_v4  ;;  %v264_v7 = vsub.f32 %v260_v3, %v262_v5  ;;  %v245_v9 = vshrl.u32 %v244_v1, 7  ;;  %v248_v14 = vand.u32 127, %v244_v1  ;;  %s313_s3 = sshll.u32 %s230_s27, 4  ;;  %s424_s28 = sshll.u32 %s686_s14, 4  ;;  %s865_s3 = int_to_ptr.vmem [resolvable:$true] %s313_s3 }
  0x55   : > { %v256_v19 = vstv %s255_s18  ;;  %s870_s22 = scalar_lea.hbm %s923_s2, %s424_s28  ;;  %s301_s23 = scalar_lea.sflag [#allocation5], %s229_s20 }
  0x56   : > { %v265_v8 = vmul.f32 %v263_v6, %v263_v6  ;;  %v266_v10 = vmul.f32 %v264_v7, %v264_v7  ;;  %v246_v13 = vadd.s32 8, %v245_v9  ;;  %v249_v15 = vmul.u32 128, %v245_v9  ;;  %s587_s30 = scalar_lea.vmem %s865_s3, 16  ;;  %p934_p8 = scmp.ne.s32.totalorder %s928_s25, 0 }
  0x57   : > { %p588_p2 = scmp.ne.s32.totalorder %s865_s3, %s587_s30  ;;  %s701_s4 = smov [#allocation8]  }
  0x58   : > { %v267_v11 = vadd.f32 1e-06, %v265_v8  ;;  %v268_v12 = vadd.f32 1e-06, %v266_v10  ;;  %v250_v16 = vmul.u32 128, %v246_v13  ;;  %v251_v17 = vadd.s32 %v249_v15, %v248_v14  ;;  %s591_s14 = sshll.u32 %s701_s4, 4  ;;  %s592_s14 = int_to_ptr.vmem [resolvable:$false] %s591_s14 }
  0x59   : > { %p589_p9 = pnand %p588_p2, %p934_p8  ;;  %s593_s5 = scalar_lea.vmem %s592_s14, 32 }
  0x5a   : > { %523 = vrsqrt.f32 %v267_v11  ;;  %v252_v18 = vadd.s32 %v250_v16, %v248_v14  ;;  %vm271_vm0 = vcmp.eq.f32.partialorder %v267_v11, inf  ;;  %v274_v21 = vand.u32 2147483648, %v267_v11  ;;  %v285_v38 = vld [vmem:[#allocation2] sm:$0x1]  ;;  %p594_p11 = scmp.lt.s32.totalorder %s865_s3, %s592_s14  ;;  %p595_p1 = scmp.lt.s32.totalorder %s593_s5, %s587_s30 }
  0x5b   : > { %525 = vrsqrt.f32 %v268_v12  ;;  %vm273_vm1 = vcmp.eq.f32.partialorder %v267_v11, 0.0  ;;  %vm278_vm2 = vcmp.eq.f32.partialorder %v268_v12, inf  ;;  %v281_v24 = vand.u32 2147483648, %v268_v12  ;;  %p590_p10 = pneg %p589_p9 }
  0x5c   : > { %vm257_vm3 = vcmp.lt.s32.totalorder %v251_v17, %v256_v19  ;;  %vm280_vm4 = vcmp.eq.f32.partialorder %v268_v12, 0.0  ;;  %vm258_vm5 = vcmp.lt.s32.totalorder %v252_v18, %v256_v19  ;;  %p596_p3 = por %p595_p1, %p594_p11 }
  0x5e   : > { %p597_p7 = pnand %p596_p3, %p590_p10 }
  0x64   : > { %v524_v20 = vpop.eup %523 }
  0x65   : > { %v526_v22 = vpop.eup %525  ;;  %v270_v23 = vmul.f32 %v524_v20, %v267_v11 }
  0x66   : > { %v277_v25 = vmul.f32 %v526_v22, %v268_v12 }
  0x67   : > { %v272_v26 = vsel %vm271_vm0, %v267_v11, %v270_v23 }
  0x68   : > { %v275_v27 = vsel %vm273_vm1, %v274_v21, %v272_v26  ;;  %v279_v28 = vsel %vm278_vm2, %v268_v12, %v277_v25 }
  0x69   : > { %v282_v29 = vsel %vm280_vm4, %v281_v24, %v279_v28  ;;  %v283_v30 = vsel %vm257_vm3, %v275_v27, 0.0 }
  0x6a   : > { %v284_v31 = vsel %vm258_vm5, %v282_v29, 0.0 }
  0x6b   : > { %v286_v32 = vadd.f32 %v284_v31, %v283_v30 }
  0x6d   : > { %v287_v33 = vrot.slane %v286_v32, 4 }
  0x6f   : > { %v288_v34 = vadd.f32 %v287_v33, %v286_v32 }
  0x71   : > { %v289_v35 = vrot.slane %v288_v34, 2 }
  0x73   : > { %v290_v36 = vadd.f32 %v289_v35, %v288_v34 }
  0x75   : > { %v291_v37 = vrot.slane %v290_v36, 1 }
  0x77   : > { %v292_v39 = vadd.f32 %v291_v37, %v290_v36 }
  0x79   : > { %v293_v40 = vadd.f32 %v292_v39, %v285_v38 }
  0x7b   : > { %294 = vst [vmem:[#allocation2] sm:$0x1] %v293_v40 }
  0x82   : > { %v298_v41 = vld [vmem:[#allocation2] sm:$0x1] }
  0x83   : > { %299 = vst [vmem:[%s230_s27] sm:$0x1] %v298_v41 }
  0x84   : > { %600 = shalt.err (!%p597_p7)
}
  0x85   : > { %s601_s6 = scalar_lea.hbm %s870_s22, 16  ;;  %s605_s8 = scalar_lea.hbm %s923_s2, 32 }
  0x86   : > { %p602_p13 = scmp.ne.s32.totalorder %s870_s22, %s601_s6  ;;  %p606_p12 = scmp.lt.u32.totalorder %s870_s22, %s923_s2 }
  0x87   : > { %p607_p0 = scmp.lt.u32.totalorder %s605_s8, %s601_s6  ;;  %p609_p2 = scmp.lt.u32.totalorder %s601_s6, %s870_s22 }
  0x88   : > { %p603_p4 = pnand %p602_p13, %p934_p8 }
  0x89   : > { %p608_p5 = por %p607_p0, %p606_p12 }
  0x8a   : > { %p604_p6 = pneg %p603_p4 }
  0x8b   : > { %p610_p9 = por %p609_p2, %p608_p5 }
  0x8d   : > { %p611_p10 = pnand %p610_p9, %p604_p6 }
  0x8f   : > { %614 = shalt.err (!%p611_p10)
}
  0x90   : > { %433 = dma.vmem_to_hbm [thread:$0]  (%p934_p8), %s865_s3, 16, %s870_s22, %s301_s23  }
  0x91 PF: > { %s325_s20 = sand.u32 1, %s666_s9   ;;  %p935_p11 = scmp.ne.s32.totalorder %s929_s26, 0 }
  0x92   : > { %p936_p1 = scmp.ge.s32.totalorder %s694_s16, 2  ;;  %s326_s27 = scalar_lea.sflag [#allocation5], %s325_s20 }
  0x94   : > { %p443_p3 = pnand %p936_p1, %p935_p11 }
  0x96   : > { %660 = dma.done.wait (!%p443_p3), %s326_s27, 16  }
  0x97   : > { %662 = vsyncadd (!%p443_p3), %s326_s27, 4294967280  ;;  %s21_s16 = sadd.s32 1, %s694_s16   ;;  %s937_s9 = smov %s670_s10 }
  0x98   : > { %p18_p7 = scmp.ge.s32.totalorder %s21_s16, 4   ;;  %s938_s10 = smov %s674_s11 }
  0x99   : > { %s939_s11 = smov %s775_s24  ;;  %s940_s12 = smov %s682_s13 }
  0x9a   : > { %s911_s13 = smov 0   ;;  %s941_s14 = smov %s690_s15 }
  0x9b   : > { %s942_s15 = smov %s944_s19  ;;  %20 = sbr.rel (!%p18_p7) target bundleno = 9 (0x9), region = 94 }
  0xa2   :  { %330 = vsyncpa [#allocation4], 1 }
  0xa3   :  { %332 = vsyncpa [#allocation4 + $0x1], 1 }
  0xa4   :  { %333 = vsyncpa [#allocation7], 1 }
  0xa5   :  { %335 = vsyncpa [#allocation7 + $0x1], 1 }
  0xa6   :  { %336 = vsyncpa [#allocation5], 1 }
  0xa7   :  { %338 = vsyncpa [#allocation5 + $0x1], 1 }

</bundles_post_ra>
